<compile_context>
chip_gen: v7x
topology: tpu7x:2x2x1
jax: 0.10.0
libtpu: 0.0.40
codegen_flags: <defaults>
</compile_context>

<pallas_src>
import math
from functools import partial

import jax
import jax.numpy as jnp
from jax.experimental import pallas as pl
from jax.experimental.pallas import tpu as pltpu

LANE = 128


def _round_up(x, m):
    return ((x + m - 1) // m) * m


def _vmem_limit_bytes():
    """~75% of physical VMEM (capped), falling back to a universally safe value."""
    try:
        cap = pltpu.get_tpu_info().vmem_capacity_bytes
        return int(min(100 * 1024 * 1024, max(32 * 1024 * 1024, (3 * cap) // 4)))
    except Exception:
        return 32 * 1024 * 1024


def _a_view(n, d, *, kd):
    # depth-shifted view of the kw-fused input slab (block size 1 on depth)
    return (n, d + kd, 0, 0)


def _conv_stats_kernel(a0_ref, a1_ref, a2_ref, w_ref, b_ref, y_ref, st_ref, *,
                       H, W, CP):
    """One (n, d) step: in-VMEM (kd, kh) tap gather, 9 fused-(kw,ci) MXU matmuls
    into an fp32 accumulator (+bias), bf16 y out, packed BN partial stats."""
    HW = H * W
    acc = jnp.broadcast_to(b_ref[...], (HW, CP)).astype(jnp.float32)
    for kd, a_ref in enumerate((a0_ref, a1_ref, a2_ref)):
        for kh in range(3):
            # rows (h + kh)*W + w of the kw-fused plane == output rows shifted
            # by kh*W: a pure static row slice (no reshape, no lane shuffles).
            lhs = a_ref[0, 0, kh * W:kh * W + HW, :]          # (HW, 3*Cin) bf16
            acc = acc + jnp.dot(lhs, w_ref[kd * 3 + kh],
                                preferred_element_type=jnp.float32)
    y_ref[...] = acc.astype(y_ref.dtype)[None, None]          # bf16 intermediate
    s = jnp.sum(acc, axis=0, keepdims=True)                   # (1, CP) channel sum
    sq = jnp.sum(acc * acc, axis=0, keepdims=True)            # (1, CP) channel sumsq
    st_ref[...] = jnp.concatenate([s, sq], axis=0)[None, None]


def _bn_lrelu_kernel(y_ref, sc_ref, sh_ref, o_ref, *, slope):
    """One (n, d) step: y -> y*scale + shift (== (y-mean)*rsqrt(var+eps)) -> LeakyReLU."""
    y = y_ref[0, 0].astype(jnp.float32)                       # (HW, CP)
    xhat = y * sc_ref[...] + sh_ref[...]
    o_ref[...] = jnp.where(xhat >= 0.0, xhat, slope * xhat)[None, None]


def conv_block_forward(x, weight, bias, *, eps=1e-5, slope=0.2):
    """x: (N, Cin, D, H, W) fp32.  weight: (Cout, Cin, 3, 3, 3).  bias: (Cout,)."""
    N, Cin, D, H, W = x.shape
    Cout = weight.shape[0]
    HW = H * W
    R3 = (H + 2) * W          # rows of one kw-fused, h-padded depth plane
    C3 = 3 * Cin              # kw-fused K width per (kd, kh) matmul
    CP = _round_up(Cout, LANE)
    M = N * D * H * W

    # ---- wrapper glue: the ONLY wrapper-side gather is the 3x kw fusion ------
    xcl = jnp.transpose(x, (0, 2, 3, 4, 1)).astype(jnp.bfloat16)    # (N,D,H,W,Cin)
    xpad = jnp.pad(xcl, ((0, 0), (1, 1), (1, 1), (1, 1), (0, 0)))   # (N,D+2,H+2,W+2,Cin)
    a = jnp.concatenate([xpad[:, :, :, kw:kw + W, :] for kw in range(3)],
                        axis=-1)                                    # (N,D+2,H+2,W,3Cin)
    a2 = a.reshape(N, D + 2, R3, C3)                                # contiguous -> free

    # weight[co, ci, kd, kh, kw] -> Wf[kd*3+kh, kw*Cin+ci, co], Cout lane-padded
    wt = jnp.transpose(weight, (2, 3, 4, 1, 0)).reshape(9, C3, Cout)
    w_f = jnp.pad(wt, ((0, 0), (0, 0), (0, CP - Cout))).astype(jnp.bfloat16)
    b_row = jnp.pad(bias.astype(jnp.float32), (0, CP - Cout)).reshape(1, CP)

    cparams = pltpu.CompilerParams(
        dimension_semantics=("parallel", "parallel"),
        vmem_limit_bytes=_vmem_limit_bytes())

    # ---- pass 1: in-kernel tap gather + conv matmuls + BN partial stats ------
    y, stats = pl.pallas_call(
        partial(_conv_stats_kernel, H=H, W=W, CP=CP),
        out_shape=(
            jax.ShapeDtypeStruct((N, D, HW, CP), jnp.bfloat16),   # conv output y
            jax.ShapeDtypeStruct((N, D, 2, CP), jnp.float32),     # packed partials
        ),
        grid_spec=pltpu.PrefetchScalarGridSpec(
            num_scalar_prefetch=0,
            grid=(N, D),
            in_specs=[
                pl.BlockSpec((1, 1, R3, C3), partial(_a_view, kd=0)),
                pl.BlockSpec((1, 1, R3, C3), partial(_a_view, kd=1)),
                pl.BlockSpec((1, 1, R3, C3), partial(_a_view, kd=2)),
                pl.BlockSpec((9, C3, CP), lambda n, d: (0, 0, 0),
                             pipeline_mode=pl.Buffered(1)),        # resident weight
                pl.BlockSpec((1, CP), lambda n, d: (0, 0),
                             pipeline_mode=pl.Buffered(1)),        # resident bias
            ],
            out_specs=(
                pl.BlockSpec((1, 1, HW, CP), lambda n, d: (n, d, 0, 0)),
                pl.BlockSpec((1, 1, 2, CP), lambda n, d: (n, d, 0, 0)),
            ),
        ),
        compiler_params=cparams,
    )(a2, a2, a2, w_f, b_row)

    # ---- tiny cross-tile combine + BN coefficients (fp32, wrapper) -----------
    ch_sum = jnp.sum(stats[:, :, 0, :], axis=(0, 1))       # (CP,)
    ch_sq = jnp.sum(stats[:, :, 1, :], axis=(0, 1))
    mean = ch_sum / M                                      # biased batch stats
    # NOTE: E[x^2] - E[x]^2 in fp32; fine here (batch mean ~ bias scale).  A
    # mean-shifted / Welford combine would be more robust for large offsets.
    var = jnp.maximum(ch_sq / M - mean * mean, 0.0)
    scale = jax.lax.rsqrt(var + eps)                       # BN gamma = 1
    shift = -mean * scale                                  # BN beta  = 0
    sc_row = scale.reshape(1, CP).astype(jnp.float32)
    sh_row = shift.reshape(1, CP).astype(jnp.float32)

    # ---- pass 2: normalize + LeakyReLU over the same (n, d) grid -------------
    out_cl = pl.pallas_call(
        partial(_bn_lrelu_kernel, slope=slope),
        out_shape=jax.ShapeDtypeStruct((N, D, HW, CP), jnp.float32),
        grid_spec=pltpu.PrefetchScalarGridSpec(
            num_scalar_prefetch=0,
            grid=(N, D),
            in_specs=[
                pl.BlockSpec((1, 1, HW, CP), lambda n, d: (n, d, 0, 0)),
                pl.BlockSpec((1, CP), lambda n, d: (0, 0),
                             pipeline_mode=pl.Buffered(1)),
                pl.BlockSpec((1, CP), lambda n, d: (0, 0),
                             pipeline_mode=pl.Buffered(1)),
            ],
            out_specs=pl.BlockSpec((1, 1, HW, CP), lambda n, d: (n, d, 0, 0)),
        ),
        compiler_params=cparams,
    )(y, sc_row, sh_row)

    # TODO(synk): BatchNorm3d running_mean/running_var updates (training-time
    # side effect only) are not modeled; they do not affect this forward output.
    # TODO(synk): the final channels-last -> NCDHW relayout below is still done
    # by XLA; folding it into pass 2 (channels-major output + in-kernel
    # transpose) would remove one more HBM round trip of the output.
    out = out_cl[:, :, :, :Cout].reshape(N, D, H, W, Cout)
    return jnp.transpose(out, (0, 4, 1, 2, 3))              # back to NCDHW


def reference(x, weight, bias, eps=1e-5, slope=0.2):
    y = jax.lax.conv_general_dilated(
        x, weight, window_strides=(1, 1, 1),
        padding=((1, 1), (1, 1), (1, 1)),
        dimension_numbers=('NCDHW', 'OIDHW', 'NCDHW'))
    y = y + bias.reshape(1, -1, 1, 1, 1)
    mean = jnp.mean(y, axis=(0, 2, 3, 4), keepdims=True)
    var = jnp.mean((y - mean) ** 2, axis=(0, 2, 3, 4), keepdims=True)
    yhat = (y - mean) * jax.lax.rsqrt(var + eps)
    return jnp.where(yhat >= 0, yhat, slope * yhat)


if __name__ == "__main__":
    key = jax.random.PRNGKey(0)
    kx, kw = jax.random.split(key)

    N, Cin, Cout = 2, 4, 8
    D = H = W = 6

    x = jax.random.normal(kx, (N, Cin, D, H, W), dtype=jnp.float32)

    # Deterministic kaiming_normal_ init (a=0.2, fan_in, leaky_relu gain) to
    # match nn.init.kaiming_normal_(weight, a=0.2); bias zero-initialized.
    a = 0.2
    fan_in = Cin * 3 * 3 * 3
    std = math.sqrt(2.0 / (1.0 + a * a)) / math.sqrt(fan_in)
    weight = std * jax.random.normal(kw, (Cout, Cin, 3, 3, 3), dtype=jnp.float32)
    bias = jnp.zeros((Cout,), dtype=jnp.float32)

    fwd = jax.jit(conv_block_forward)
    out = jax.block_until_ready(fwd(x, weight, bias))

    ref = reference(x, weight, bias)
    assert out.shape == (N, Cout, D, H, W)
    # bf16 matmul operands + bf16 intermediate y (fp32 accumulation / BN math)
    # vs fp32 reference: expected max abs error ~1-3e-2; use a safe bound.
    max_err = float(jnp.max(jnp.abs(out - ref)))
    assert max_err < 7.5e-2, f"mismatch vs reference: max abs err {max_err}"

    print("KERNEL_OK")
</pallas_src>

<mosaic_0001>
module attributes {stable_mosaic.version = 11 : i64} {
  func.func @_conv_stats_kernel(%arg0: i32, %arg1: i32, %arg2: memref<1x1x48x12xbf16, #tpu.memory_space<vmem>>, %arg3: memref<1x1x48x12xbf16, #tpu.memory_space<vmem>>, %arg4: memref<1x1x48x12xbf16, #tpu.memory_space<vmem>>, %arg5: memref<9x12x128xbf16, #tpu.memory_space<vmem>>, %arg6: memref<1x128xf32, #tpu.memory_space<vmem>>, %arg7: memref<1x1x36x128xbf16, #tpu.memory_space<vmem>>, %arg8: memref<1x1x2x128xf32, #tpu.memory_space<vmem>>) attributes {dimension_semantics = [#tpu.dimension_semantics<parallel>, #tpu.dimension_semantics<parallel>], iteration_bounds = array<i64: 2, 6>, scalar_prefetch = 0 : i64, scratch_operands = 0 : i64, tpu.core_type = #tpu.core_type<tc>, window_params = [{transform_indices = @transform_0, window_bounds = array<i64: 1, 1, 48, 12>}, {transform_indices = @transform_1, window_bounds = array<i64: 1, 1, 48, 12>}, {transform_indices = @transform_2, window_bounds = array<i64: 1, 1, 48, 12>}, {pipeline_mode = #tpu.pipeline_mode<synchronous>, transform_indices = @transform_3, window_bounds = array<i64: 9, 12, 128>}, {pipeline_mode = #tpu.pipeline_mode<synchronous>, transform_indices = @transform_4, window_bounds = array<i64: 1, 128>}, {transform_indices = @transform_5, window_bounds = array<i64: 1, 1, 36, 128>}, {transform_indices = @transform_6, window_bounds = array<i64: 1, 1, 2, 128>}]} {
    %c0 = arith.constant 0 : index
    %c0_0 = arith.constant 0 : index
    %0 = vector.load %arg6[%c0, %c0_0] : memref<1x128xf32, #tpu.memory_space<vmem>>, vector<1x128xf32>
    %1 = vector.shape_cast %0 : vector<1x128xf32> to vector<1x128xf32>
    %2 = vector.broadcast %1 : vector<1x128xf32> to vector<36x128xf32>
    %c0_1 = arith.constant 0 : index
    %c0_2 = arith.constant 0 : index
    %c0_3 = arith.constant 0 : index
    %c0_4 = arith.constant 0 : index
    %3 = vector.load %arg2[%c0_1, %c0_2, %c0_3, %c0_4] : memref<1x1x48x12xbf16, #tpu.memory_space<vmem>>, vector<1x1x36x12xbf16>
    %4 = vector.shape_cast %3 : vector<1x1x36x12xbf16> to vector<36x12xbf16>
    %c0_5 = arith.constant 0 : index
    %c0_6 = arith.constant 0 : index
    %c0_7 = arith.constant 0 : index
    %5 = vector.load %arg5[%c0_5, %c0_6, %c0_7] : memref<9x12x128xbf16, #tpu.memory_space<vmem>>, vector<1x12x128xbf16>
    %6 = vector.shape_cast %5 : vector<1x12x128xbf16> to vector<12x128xbf16>
    %cst = arith.constant dense<0.000000e+00> : vector<36x128xf32>
    %7 = tpu.matmul %4, %6, %cst {dimension_numbers = #tpu.dot_dimension_numbers<[1], [0], [0], [1], [0, 0, 1, 1], [], []>} : vector<36x12xbf16>, vector<12x128xbf16>, vector<36x128xf32> -> vector<36x128xf32>
    %8 = arith.addf %2, %7 : vector<36x128xf32>
    %c0_8 = arith.constant 0 : index
    %c0_9 = arith.constant 0 : index
    %c6 = arith.constant 6 : index
    %c0_10 = arith.constant 0 : index
    %9 = vector.load %arg2[%c0_8, %c0_9, %c6, %c0_10] : memref<1x1x48x12xbf16, #tpu.memory_space<vmem>>, vector<1x1x36x12xbf16>
    %10 = vector.shape_cast %9 : vector<1x1x36x12xbf16> to vector<36x12xbf16>
    %c1 = arith.constant 1 : index
    %c0_11 = arith.constant 0 : index
    %c0_12 = arith.constant 0 : index
    %11 = vector.load %arg5[%c1, %c0_11, %c0_12] : memref<9x12x128xbf16, #tpu.memory_space<vmem>>, vector<1x12x128xbf16>
    %12 = vector.shape_cast %11 : vector<1x12x128xbf16> to vector<12x128xbf16>
    %cst_13 = arith.constant dense<0.000000e+00> : vector<36x128xf32>
    %13 = tpu.matmul %10, %12, %cst_13 {dimension_numbers = #tpu.dot_dimension_numbers<[1], [0], [0], [1], [0, 0, 1, 1], [], []>} : vector<36x12xbf16>, vector<12x128xbf16>, vector<36x128xf32> -> vector<36x128xf32>
    %14 = arith.addf %8, %13 : vector<36x128xf32>
    %c0_14 = arith.constant 0 : index
    %c0_15 = arith.constant 0 : index
    %c12 = arith.constant 12 : index
    %c0_16 = arith.constant 0 : index
    %15 = vector.load %arg2[%c0_14, %c0_15, %c12, %c0_16] : memref<1x1x48x12xbf16, #tpu.memory_space<vmem>>, vector<1x1x36x12xbf16>
    %16 = vector.shape_cast %15 : vector<1x1x36x12xbf16> to vector<36x12xbf16>
    %c2 = arith.constant 2 : index
    %c0_17 = arith.constant 0 : index
    %c0_18 = arith.constant 0 : index
    %17 = vector.load %arg5[%c2, %c0_17, %c0_18] : memref<9x12x128xbf16, #tpu.memory_space<vmem>>, vector<1x12x128xbf16>
    %18 = vector.shape_cast %17 : vector<1x12x128xbf16> to vector<12x128xbf16>
    %cst_19 = arith.constant dense<0.000000e+00> : vector<36x128xf32>
    %19 = tpu.matmul %16, %18, %cst_19 {dimension_numbers = #tpu.dot_dimension_numbers<[1], [0], [0], [1], [0, 0, 1, 1], [], []>} : vector<36x12xbf16>, vector<12x128xbf16>, vector<36x128xf32> -> vector<36x128xf32>
    %20 = arith.addf %14, %19 : vector<36x128xf32>
    %c0_20 = arith.constant 0 : index
    %c0_21 = arith.constant 0 : index
    %c0_22 = arith.constant 0 : index
    %c0_23 = arith.constant 0 : index
    %21 = vector.load %arg3[%c0_20, %c0_21, %c0_22, %c0_23] : memref<1x1x48x12xbf16, #tpu.memory_space<vmem>>, vector<1x1x36x12xbf16>
    %22 = vector.shape_cast %21 : vector<1x1x36x12xbf16> to vector<36x12xbf16>
    %c3 = arith.constant 3 : index
    %c0_24 = arith.constant 0 : index
    %c0_25 = arith.constant 0 : index
    %23 = vector.load %arg5[%c3, %c0_24, %c0_25] : memref<9x12x128xbf16, #tpu.memory_space<vmem>>, vector<1x12x128xbf16>
    %24 = vector.shape_cast %23 : vector<1x12x128xbf16> to vector<12x128xbf16>
    %cst_26 = arith.constant dense<0.000000e+00> : vector<36x128xf32>
    %25 = tpu.matmul %22, %24, %cst_26 {dimension_numbers = #tpu.dot_dimension_numbers<[1], [0], [0], [1], [0, 0, 1, 1], [], []>} : vector<36x12xbf16>, vector<12x128xbf16>, vector<36x128xf32> -> vector<36x128xf32>
    %26 = arith.addf %20, %25 : vector<36x128xf32>
    %c0_27 = arith.constant 0 : index
    %c0_28 = arith.constant 0 : index
    %c6_29 = arith.constant 6 : index
    %c0_30 = arith.constant 0 : index
    %27 = vector.load %arg3[%c0_27, %c0_28, %c6_29, %c0_30] : memref<1x1x48x12xbf16, #tpu.memory_space<vmem>>, vector<1x1x36x12xbf16>
    %28 = vector.shape_cast %27 : vector<1x1x36x12xbf16> to vector<36x12xbf16>
    %c4 = arith.constant 4 : index
    %c0_31 = arith.constant 0 : index
    %c0_32 = arith.constant 0 : index
    %29 = vector.load %arg5[%c4, %c0_31, %c0_32] : memref<9x12x128xbf16, #tpu.memory_space<vmem>>, vector<1x12x128xbf16>
    %30 = vector.shape_cast %29 : vector<1x12x128xbf16> to vector<12x128xbf16>
    %cst_33 = arith.constant dense<0.000000e+00> : vector<36x128xf32>
    %31 = tpu.matmul %28, %30, %cst_33 {dimension_numbers = #tpu.dot_dimension_numbers<[1], [0], [0], [1], [0, 0, 1, 1], [], []>} : vector<36x12xbf16>, vector<12x128xbf16>, vector<36x128xf32> -> vector<36x128xf32>
    %32 = arith.addf %26, %31 : vector<36x128xf32>
    %c0_34 = arith.constant 0 : index
    %c0_35 = arith.constant 0 : index
    %c12_36 = arith.constant 12 : index
    %c0_37 = arith.constant 0 : index
    %33 = vector.load %arg3[%c0_34, %c0_35, %c12_36, %c0_37] : memref<1x1x48x12xbf16, #tpu.memory_space<vmem>>, vector<1x1x36x12xbf16>
    %34 = vector.shape_cast %33 : vector<1x1x36x12xbf16> to vector<36x12xbf16>
    %c5 = arith.constant 5 : index
    %c0_38 = arith.constant 0 : index
    %c0_39 = arith.constant 0 : index
    %35 = vector.load %arg5[%c5, %c0_38, %c0_39] : memref<9x12x128xbf16, #tpu.memory_space<vmem>>, vector<1x12x128xbf16>
    %36 = vector.shape_cast %35 : vector<1x12x128xbf16> to vector<12x128xbf16>
    %cst_40 = arith.constant dense<0.000000e+00> : vector<36x128xf32>
    %37 = tpu.matmul %34, %36, %cst_40 {dimension_numbers = #tpu.dot_dimension_numbers<[1], [0], [0], [1], [0, 0, 1, 1], [], []>} : vector<36x12xbf16>, vector<12x128xbf16>, vector<36x128xf32> -> vector<36x128xf32>
    %38 = arith.addf %32, %37 : vector<36x128xf32>
    %c0_41 = arith.constant 0 : index
    %c0_42 = arith.constant 0 : index
    %c0_43 = arith.constant 0 : index
    %c0_44 = arith.constant 0 : index
    %39 = vector.load %arg4[%c0_41, %c0_42, %c0_43, %c0_44] : memref<1x1x48x12xbf16, #tpu.memory_space<vmem>>, vector<1x1x36x12xbf16>
    %40 = vector.shape_cast %39 : vector<1x1x36x12xbf16> to vector<36x12xbf16>
    %c6_45 = arith.constant 6 : index
    %c0_46 = arith.constant 0 : index
    %c0_47 = arith.constant 0 : index
    %41 = vector.load %arg5[%c6_45, %c0_46, %c0_47] : memref<9x12x128xbf16, #tpu.memory_space<vmem>>, vector<1x12x128xbf16>
    %42 = vector.shape_cast %41 : vector<1x12x128xbf16> to vector<12x128xbf16>
    %cst_48 = arith.constant dense<0.000000e+00> : vector<36x128xf32>
    %43 = tpu.matmul %40, %42, %cst_48 {dimension_numbers = #tpu.dot_dimension_numbers<[1], [0], [0], [1], [0, 0, 1, 1], [], []>} : vector<36x12xbf16>, vector<12x128xbf16>, vector<36x128xf32> -> vector<36x128xf32>
    %44 = arith.addf %38, %43 : vector<36x128xf32>
    %c0_49 = arith.constant 0 : index
    %c0_50 = arith.constant 0 : index
    %c6_51 = arith.constant 6 : index
    %c0_52 = arith.constant 0 : index
    %45 = vector.load %arg4[%c0_49, %c0_50, %c6_51, %c0_52] : memref<1x1x48x12xbf16, #tpu.memory_space<vmem>>, vector<1x1x36x12xbf16>
    %46 = vector.shape_cast %45 : vector<1x1x36x12xbf16> to vector<36x12xbf16>
    %c7 = arith.constant 7 : index
    %c0_53 = arith.constant 0 : index
    %c0_54 = arith.constant 0 : index
    %47 = vector.load %arg5[%c7, %c0_53, %c0_54] : memref<9x12x128xbf16, #tpu.memory_space<vmem>>, vector<1x12x128xbf16>
    %48 = vector.shape_cast %47 : vector<1x12x128xbf16> to vector<12x128xbf16>
    %cst_55 = arith.constant dense<0.000000e+00> : vector<36x128xf32>
    %49 = tpu.matmul %46, %48, %cst_55 {dimension_numbers = #tpu.dot_dimension_numbers<[1], [0], [0], [1], [0, 0, 1, 1], [], []>} : vector<36x12xbf16>, vector<12x128xbf16>, vector<36x128xf32> -> vector<36x128xf32>
    %50 = arith.addf %44, %49 : vector<36x128xf32>
    %c0_56 = arith.constant 0 : index
    %c0_57 = arith.constant 0 : index
    %c12_58 = arith.constant 12 : index
    %c0_59 = arith.constant 0 : index
    %51 = vector.load %arg4[%c0_56, %c0_57, %c12_58, %c0_59] : memref<1x1x48x12xbf16, #tpu.memory_space<vmem>>, vector<1x1x36x12xbf16>
    %52 = vector.shape_cast %51 : vector<1x1x36x12xbf16> to vector<36x12xbf16>
    %c8 = arith.constant 8 : index
    %c0_60 = arith.constant 0 : index
    %c0_61 = arith.constant 0 : index
    %53 = vector.load %arg5[%c8, %c0_60, %c0_61] : memref<9x12x128xbf16, #tpu.memory_space<vmem>>, vector<1x12x128xbf16>
    %54 = vector.shape_cast %53 : vector<1x12x128xbf16> to vector<12x128xbf16>
    %cst_62 = arith.constant dense<0.000000e+00> : vector<36x128xf32>
    %55 = tpu.matmul %52, %54, %cst_62 {dimension_numbers = #tpu.dot_dimension_numbers<[1], [0], [0], [1], [0, 0, 1, 1], [], []>} : vector<36x12xbf16>, vector<12x128xbf16>, vector<36x128xf32> -> vector<36x128xf32>
    %56 = arith.addf %50, %55 : vector<36x128xf32>
    %57 = arith.truncf %56 : vector<36x128xf32> to vector<36x128xbf16>
    %58 = vector.shape_cast %57 : vector<36x128xbf16> to vector<1x1x36x128xbf16>
    %c0_63 = arith.constant 0 : index
    %c0_64 = arith.constant 0 : index
    %c0_65 = arith.constant 0 : index
    %c0_66 = arith.constant 0 : index
    %59 = vector.load %arg7[%c0_63, %c0_64, %c0_65, %c0_66] : memref<1x1x36x128xbf16, #tpu.memory_space<vmem>>, vector<1x1x36x128xbf16>
    tpu.vector_store %arg7[%c0_63, %c0_64, %c0_65, %c0_66], %58 {strides = array<i32>} : memref<1x1x36x128xbf16, #tpu.memory_space<vmem>>, vector<1x1x36x128xbf16>,
    %cst_67 = arith.constant dense<0.000000e+00> : vector<128xf32>
    %60 = vector.multi_reduction <add>, %56, %cst_67 [0] : vector<36x128xf32> to vector<128xf32>
    %61 = vector.shape_cast %60 : vector<128xf32> to vector<1x128xf32>
    %62 = arith.mulf %56, %56 : vector<36x128xf32>
    %cst_68 = arith.constant dense<0.000000e+00> : vector<128xf32>
    %63 = vector.multi_reduction <add>, %62, %cst_68 [0] : vector<36x128xf32> to vector<128xf32>
    %64 = vector.shape_cast %63 : vector<128xf32> to vector<1x128xf32>
    %65 = tpu.concatenate %61, %64 in 0 : vector<1x128xf32>, vector<1x128xf32> -> vector<2x128xf32>
    %66 = vector.shape_cast %65 : vector<2x128xf32> to vector<1x1x2x128xf32>
    %c0_69 = arith.constant 0 : index
    %c0_70 = arith.constant 0 : index
    %c0_71 = arith.constant 0 : index
    %c0_72 = arith.constant 0 : index
    %67 = vector.load %arg8[%c0_69, %c0_70, %c0_71, %c0_72] : memref<1x1x2x128xf32, #tpu.memory_space<vmem>>, vector<1x1x2x128xf32>
    tpu.vector_store %arg8[%c0_69, %c0_70, %c0_71, %c0_72], %66 {strides = array<i32>} : memref<1x1x2x128xf32, #tpu.memory_space<vmem>>, vector<1x1x2x128xf32>,
    return
  }
  func.func @transform_0(%arg0: i32, %arg1: i32) -> (i32, i32, i32, i32) {
    %c0_i32 = arith.constant 0 : i32
    %0 = arith.addi %arg1, %c0_i32 : i32
    %c0_i32_0 = arith.constant 0 : i32
    %c0_i32_1 = arith.constant 0 : i32
    %c0_i32_2 = arith.constant 0 : i32
    return %arg0, %0, %c0_i32_0, %c0_i32_1 : i32, i32, i32, i32
  }
  func.func @transform_1(%arg0: i32, %arg1: i32) -> (i32, i32, i32, i32) {
    %c1_i32 = arith.constant 1 : i32
    %0 = arith.addi %arg1, %c1_i32 : i32
    %c0_i32 = arith.constant 0 : i32
    %c0_i32_0 = arith.constant 0 : i32
    %c0_i32_1 = arith.constant 0 : i32
    return %arg0, %0, %c0_i32, %c0_i32_0 : i32, i32, i32, i32
  }
  func.func @transform_2(%arg0: i32, %arg1: i32) -> (i32, i32, i32, i32) {
    %c2_i32 = arith.constant 2 : i32
    %0 = arith.addi %arg1, %c2_i32 : i32
    %c0_i32 = arith.constant 0 : i32
    %c0_i32_0 = arith.constant 0 : i32
    %c0_i32_1 = arith.constant 0 : i32
    return %arg0, %0, %c0_i32, %c0_i32_0 : i32, i32, i32, i32
  }
  func.func @transform_3(%arg0: i32, %arg1: i32) -> (i32, i32, i32) {
    %c0_i32 = arith.constant 0 : i32
    %c0_i32_0 = arith.constant 0 : i32
    %c0_i32_1 = arith.constant 0 : i32
    %c0_i32_2 = arith.constant 0 : i32
    return %c0_i32, %c0_i32_0, %c0_i32_1 : i32, i32, i32
  }
  func.func @transform_4(%arg0: i32, %arg1: i32) -> (i32, i32) {
    %c0_i32 = arith.constant 0 : i32
    %c0_i32_0 = arith.constant 0 : i32
    %c0_i32_1 = arith.constant 0 : i32
    return %c0_i32, %c0_i32_0 : i32, i32
  }
  func.func @transform_5(%arg0: i32, %arg1: i32) -> (i32, i32, i32, i32) {
    %c0_i32 = arith.constant 0 : i32
    %c0_i32_0 = arith.constant 0 : i32
    %c0_i32_1 = arith.constant 0 : i32
    return %arg0, %arg1, %c0_i32, %c0_i32_0 : i32, i32, i32, i32
  }
  func.func @transform_6(%arg0: i32, %arg1: i32) -> (i32, i32, i32, i32) {
    %c0_i32 = arith.constant 0 : i32
    %c0_i32_0 = arith.constant 0 : i32
    %c0_i32_1 = arith.constant 0 : i32
    return %arg0, %arg1, %c0_i32, %c0_i32_0 : i32, i32, i32, i32
  }
}

module attributes {stable_mosaic.version = 11 : i64} {
  func.func @_bn_lrelu_kernel(%arg0: i32, %arg1: i32, %arg2: memref<1x1x36x128xbf16, #tpu.memory_space<vmem>>, %arg3: memref<1x128xf32, #tpu.memory_space<vmem>>, %arg4: memref<1x128xf32, #tpu.memory_space<vmem>>, %arg5: memref<1x1x36x128xf32, #tpu.memory_space<vmem>>) attributes {dimension_semantics = [#tpu.dimension_semantics<parallel>, #tpu.dimension_semantics<parallel>], iteration_bounds = array<i64: 2, 6>, scalar_prefetch = 0 : i64, scratch_operands = 0 : i64, tpu.core_type = #tpu.core_type<tc>, window_params = [{transform_indices = @transform_0, window_bounds = array<i64: 1, 1, 36, 128>}, {pipeline_mode = #tpu.pipeline_mode<synchronous>, transform_indices = @transform_1, window_bounds = array<i64: 1, 128>}, {pipeline_mode = #tpu.pipeline_mode<synchronous>, transform_indices = @transform_2, window_bounds = array<i64: 1, 128>}, {transform_indices = @transform_3, window_bounds = array<i64: 1, 1, 36, 128>}]} {
    %c0 = arith.constant 0 : index
    %c0_0 = arith.constant 0 : index
    %c0_1 = arith.constant 0 : index
    %c0_2 = arith.constant 0 : index
    %0 = vector.load %arg2[%c0, %c0_0, %c0_1, %c0_2] : memref<1x1x36x128xbf16, #tpu.memory_space<vmem>>, vector<1x1x36x128xbf16>
    %1 = vector.shape_cast %0 : vector<1x1x36x128xbf16> to vector<36x128xbf16>
    %2 = arith.extf %1 : vector<36x128xbf16> to vector<36x128xf32>
    %c0_3 = arith.constant 0 : index
    %c0_4 = arith.constant 0 : index
    %3 = vector.load %arg3[%c0_3, %c0_4] : memref<1x128xf32, #tpu.memory_space<vmem>>, vector<1x128xf32>
    %4 = vector.broadcast %3 : vector<1x128xf32> to vector<36x128xf32>
    %5 = arith.mulf %2, %4 : vector<36x128xf32>
    %c0_5 = arith.constant 0 : index
    %c0_6 = arith.constant 0 : index
    %6 = vector.load %arg4[%c0_5, %c0_6] : memref<1x128xf32, #tpu.memory_space<vmem>>, vector<1x128xf32>
    %7 = vector.broadcast %6 : vector<1x128xf32> to vector<36x128xf32>
    %8 = arith.addf %5, %7 : vector<36x128xf32>
    %cst = arith.constant 0.000000e+00 : f32
    %9 = vector.broadcast %cst : f32 to vector<36x128xf32>
    %10 = arith.cmpf oge, %8, %9 : vector<36x128xf32>
    %cst_7 = arith.constant 2.000000e-01 : f32
    %11 = vector.broadcast %cst_7 : f32 to vector<36x128xf32>
    %12 = arith.mulf %11, %8 : vector<36x128xf32>
    %13 = arith.select %10, %8, %12 : vector<36x128xi1>, vector<36x128xf32>
    %14 = vector.shape_cast %13 : vector<36x128xf32> to vector<1x1x36x128xf32>
    %c0_8 = arith.constant 0 : index
    %c0_9 = arith.constant 0 : index
    %c0_10 = arith.constant 0 : index
    %c0_11 = arith.constant 0 : index
    %15 = vector.load %arg5[%c0_8, %c0_9, %c0_10, %c0_11] : memref<1x1x36x128xf32, #tpu.memory_space<vmem>>, vector<1x1x36x128xf32>
    tpu.vector_store %arg5[%c0_8, %c0_9, %c0_10, %c0_11], %14 {strides = array<i32>} : memref<1x1x36x128xf32, #tpu.memory_space<vmem>>, vector<1x1x36x128xf32>,
    return
  }
  func.func @transform_0(%arg0: i32, %arg1: i32) -> (i32, i32, i32, i32) {
    %c0_i32 = arith.constant 0 : i32
    %c0_i32_0 = arith.constant 0 : i32
    %c0_i32_1 = arith.constant 0 : i32
    return %arg0, %arg1, %c0_i32, %c0_i32_0 : i32, i32, i32, i32
  }
  func.func @transform_1(%arg0: i32, %arg1: i32) -> (i32, i32) {
    %c0_i32 = arith.constant 0 : i32
    %c0_i32_0 = arith.constant 0 : i32
    %c0_i32_1 = arith.constant 0 : i32
    return %c0_i32, %c0_i32_0 : i32, i32
  }
  func.func @transform_2(%arg0: i32, %arg1: i32) -> (i32, i32) {
    %c0_i32 = arith.constant 0 : i32
    %c0_i32_0 = arith.constant 0 : i32
    %c0_i32_1 = arith.constant 0 : i32
    return %c0_i32, %c0_i32_0 : i32, i32
  }
  func.func @transform_3(%arg0: i32, %arg1: i32) -> (i32, i32, i32, i32) {
    %c0_i32 = arith.constant 0 : i32
    %c0_i32_0 = arith.constant 0 : i32
    %c0_i32_1 = arith.constant 0 : i32
    return %arg0, %arg1, %c0_i32, %c0_i32_0 : i32, i32, i32, i32
  }
}

</mosaic_0001>

<bundles_post_ra>
// kernel: conv_block_forward.3
= control target key start
LH: loop header
LB: loop body
LE: loop exit
PB: predicated region body
PF: predicated region fallthrough
CT: control target
= control target key end

     0   :  { %s478_s12 = smov 0   ;;  %s480_s13 = smov 0   ;;  %s535_s0 = inlined_call_operand.vmem [shape: bf16[2,6,36,128], index: 0, kind: input, shape index: {}]   ;;  %s536_s1 = inlined_call_operand.vmem [shape: f32[1,128], index: 1, kind: input, shape index: {}]   ;;  %s537_s2 = inlined_call_operand.vmem [shape: f32[1,128], index: 2, kind: input, shape index: {}]   ;;  %s538_s3 = inlined_call_operand.vmem [shape: f32[2,6,36,128], index: 3, kind: output, shape index: {}]  }
   0x1   :  { %s482_s14 = smov 0   ;;  %s484_s15 = smov 0  }
   0x2   :  { %s486_s16 = smov 0  }
   0x3 LB: > { %s22_s17 = sadd.s32 1, %s448_s14  ;;  %s25_s18 = sadd.s32 1, %s452_s15  ;;  %s456_s16 = sphi %s486_s16, %s13_s16   ;;  %s452_s15 = sphi %s484_s15, %s542_s15   ;;  %s448_s14 = sphi %s482_s14, %s541_s14   ;;  %s444_s13 = sphi %s480_s13, %s540_s13   ;;  %s440_s12 = sphi %s478_s12, %s539_s12  }
   0x4   : > { %p23_p0 = scmp.ge.s32.totalorder %s22_s17, 6  ;;  %p360_p1 = scmp.ge.s32.totalorder %s456_s16, 1 }
   0x5   : > { %p157_p2 = scmp.lt.s32.totalorder %s456_s16, 13 }
   0x6   : > { %s544_s17 = smov (%p23_p0, %s22_s17), 0  ;;  %s546_s18 = smov (!%p23_p0, %s25_s18), %s452_s15 }
   0x7   : > { %p158_p3 = pnand %p360_p1, %p157_p2  ;;  %p27_p4 = scmp.ge.s32.totalorder %s546_s18, 2 }
   0x8   : > { %p189_p5 = scmp.lt.s32.totalorder (!%p158_p3), %s444_s13, 1  ;;  %p191_p6 = scmp.lt.s32.totalorder (!%p158_p3), %s440_s12, 5  ;;  %v363_v0 = vld [vmem:[%s536_s1] ss:$0 sm:$0xff] (!%p158_p3) }
   0x9   : > { %s548_s18 = smov (%p27_p4, %s546_s18), 0  ;;  %161 = sbr.rel (%p158_p3) target bundleno = 36 (0x24), region = 32 }
   0xa   : > { %v364_v8 = vld [vmem:[%s537_s2] ss:$0 sm:$0xff] (!%p158_p3) }
  0x10   : > { %s550_s13 = smov (!%p189_p5, %s444_s13), 1  ;;  %s552_s12 = smov (!%p191_p6, %s440_s12), 5 }
  0x11   : > { %s377_s19 = smul.u32 30, %s550_s13 }
  0x12   : > { %s376_s20 = smul.u32 5, %s552_s12 }
  0x14   : > { %s195_s21 = sadd.s32 %s377_s19, %s376_s20 }
  0x15   : > { %s361_s22 = sshll.u32 %s195_s21, 2  ;;  %s362_s30 = sshll.u32 %s195_s21, 3 }
  0x16   : > { %s197_s25 = scalar_lea.vmem %s535_s0, %s361_s22  ;;  %s206_s6 = scalar_lea.vmem %s538_s3, %s362_s30 }
  0x17   : > { %v368_v1 = vld [vmem:[%s197_s25] sm:$0xff]   ;;  %v375_v2 = vld [vmem:[%s197_s25 + $0x8] sm:$0xff]   ;;  %v211_v3 = vld [vmem:[%s197_s25 + $0x10] sm:$0x3] }
  0x18   : > { %v369_v4 = vunpack.c.l.bf16 %v368_v1  ;;  %v370_v5 = vunpack.c.h.bf16 %v368_v1  ;;  %v373_v6 = vunpack.c.l.bf16 %v375_v2  ;;  %v374_v7 = vunpack.c.h.bf16 %v375_v2 }
  0x19   : > { %v216_v9 = vunpack.c.l.bf16 %v211_v3 }
  0x1a   : > { %v224_v10 = vmul.f32 %v369_v4, %v363_v0  ;;  %v225_v11 = vmul.f32 %v370_v5, %v363_v0  ;;  %v226_v12 = vmul.f32 %v373_v6, %v363_v0  ;;  %v227_v13 = vmul.f32 %v374_v7, %v363_v0 }
  0x1b   : > { %v228_v14 = vmul.f32 %v363_v0, %v216_v9 }
  0x1c   : > { %v236_v15 = vadd.f32 %v364_v8, %v224_v10  ;;  %v237_v16 = vadd.f32 %v364_v8, %v225_v11  ;;  %v238_v17 = vadd.f32 %v364_v8, %v226_v12  ;;  %v239_v18 = vadd.f32 %v364_v8, %v227_v13 }
  0x1d   : > { %v240_v19 = vadd.f32 %v364_v8, %v228_v14 }
  0x1e   : > { %vm241_vm0 = vcmp.ge.f32.partialorder %v236_v15, 0.0  ;;  %v246_v20 = vmul.f32 0.2, %v236_v15  ;;  %vm242_vm1 = vcmp.ge.f32.partialorder %v237_v16, 0.0  ;;  %v247_v21 = vmul.f32 0.2, %v237_v16 }
  0x1f   : > { %vm243_vm2 = vcmp.ge.f32.partialorder %v238_v17, 0.0  ;;  %v248_v22 = vmul.f32 0.2, %v238_v17  ;;  %vm244_vm3 = vcmp.ge.f32.partialorder %v239_v18, 0.0  ;;  %v249_v23 = vmul.f32 0.2, %v239_v18 }
  0x20   : > { %v251_v24 = vsel %vm241_vm0, %v236_v15, %v246_v20  ;;  %v252_v25 = vsel %vm242_vm1, %v237_v16, %v247_v21  ;;  %vm245_vm4 = vcmp.ge.f32.partialorder %v240_v19, 0.0  ;;  %v250_v26 = vmul.f32 0.2, %v240_v19 }
  0x21   : > { %256 = vst [vmem:[%s206_s6] sm:$0xff] %v251_v24  ;;  %257 = vst [vmem:[%s206_s6 + $0x8] sm:$0xff] %v252_v25  ;;  %v253_v27 = vsel %vm243_vm2, %v238_v17, %v248_v22  ;;  %v254_v28 = vsel %vm244_vm3, %v239_v18, %v249_v23 }
  0x22   : > { %258 = vst [vmem:[%s206_s6 + $0x10] sm:$0xff] %v253_v27  ;;  %259 = vst [vmem:[%s206_s6 + $0x18] sm:$0xff] %v254_v28  ;;  %v255_v29 = vsel %vm245_vm4, %v240_v19, %v250_v26 }
  0x23   : > { %260 = vst [vmem:[%s206_s6 + $0x20] sm:$0xf] %v255_v29 }
  0x24 PF: > { %s13_s16 = sadd.s32 1, %s456_s16   ;;  %s539_s12 = smov %s448_s14 }
  0x25   : > { %p10_p7 = scmp.ge.s32.totalorder %s13_s16, 14   ;;  %s540_s13 = smov %s452_s15 }
  0x26   : > { %s541_s14 = smov %s544_s17  ;;  %s542_s15 = smov %s548_s18 }
  0x27   :  { %12 = sbr.rel (!%p10_p7) target bundleno = 3 (0x3), region = 62 }

// kernel: conv_block_forward.2
= control target key start
LH: loop header
LB: loop body
LE: loop exit
PB: predicated region body
PF: predicated region fallthrough
CT: control target
= control target key end

     0   :  { %s2079_s21 = smov 0   ;;  %s2081_s22 = smov 0   ;;  %s2382_s0 = inlined_call_operand.vmem [shape: bf16[2,8,48,12], index: 0, kind: input, shape index: {}, may-alias: {0,1,2}]   ;;  %s2383_s1 = inlined_call_operand.vmem [shape: bf16[2,8,48,12], index: 1, kind: input, shape index: {}, may-alias: {0,1,2}]   ;;  %s2384_s2 = inlined_call_operand.vmem [shape: bf16[2,8,48,12], index: 2, kind: input, shape index: {}, may-alias: {0,1,2}]   ;;  %s2385_s3 = inlined_call_operand.vmem [shape: bf16[9,12,128], index: 3, kind: input, shape index: {}]   ;;  %s2386_s4 = inlined_call_operand.vmem [shape: f32[1,128], index: 4, kind: input, shape index: {}]   ;;  %s2387_s5 = inlined_call_operand.vmem [shape: bf16[2,6,36,128], index: 5, kind: output, shape index: {0}]   ;;  %s2388_s6 = inlined_call_operand.vmem [shape: f32[2,6,2,128], index: 6, kind: output, shape index: {1}]  }
   0x1   :  { %s2083_s23 = smov 0   ;;  %s2085_s24 = smov 0  }
   0x2   :  { %s2087_s25 = smov 0  }
   0x3 LB: > { %s26_s26 = sadd.s32 1, %s2032_s23  ;;  %s29_s27 = sadd.s32 1, %s2036_s24  ;;  %s2040_s25 = sphi %s2087_s25, %s17_s25   ;;  %s2036_s24 = sphi %s2085_s24, %s2392_s24   ;;  %s2032_s23 = sphi %s2083_s23, %s2391_s23   ;;  %s2028_s22 = sphi %s2081_s22, %s2390_s22   ;;  %s2024_s21 = sphi %s2079_s21, %s2389_s21  }
   0x4   : > { %p27_p0 = scmp.ge.s32.totalorder %s26_s26, 6  ;;  %p1550_p1 = scmp.ge.s32.totalorder %s2040_s25, 1 }
   0x5   : > { %p277_p2 = scmp.lt.s32.totalorder %s2040_s25, 13 }
   0x6   : > { %s2394_s26 = smov (%p27_p0, %s26_s26), 0  ;;  %s2396_s27 = smov (!%p27_p0, %s29_s27), %s2036_s24 }
   0x7   : > { %p278_p3 = pnand %p1550_p1, %p277_p2  ;;  %p31_p4 = scmp.ge.s32.totalorder %s2396_s27, 2 }
   0x8   : > { %vm434_vm0 = vcmask (!%p278_p3), 1045504   ;;  %v2042_v0 = vmov (!%p278_p3), 0.0   ;;  %v1966_v1 = vld [vmem:[%s2385_s3] sm:$0x3f] (!%p278_p3)   ;;  %p343_p5 = scmp.lt.s32.totalorder (!%p278_p3), %s2028_s22, 1  ;;  %p345_p6 = scmp.lt.s32.totalorder (!%p278_p3), %s2024_s21, 7 }
   0x9   : > { %s2398_s27 = smov (%p31_p4, %s2396_s27), 0  ;;  %281 = sbr.rel (%p278_p3) target bundleno = 366 (0x16e), region = 40 }
   0xa   : > { %1695 = vmatprep.subr.bf16.mxu1 (!%p278_p3), %v2042_v0  ;;  %1751 = vmatprep.subr.bf16.mxu0 (!%p278_p3), %v2042_v0  ;;  %vm2043_vm1 = vmmov (!%p278_p3), 0   ;;  %s363_s30 = sadd.s32 (!%p278_p3), 2, %s2024_s21  ;;  %s352_s7 = sadd.s32 (!%p278_p3), 1, %s2024_s21  ;;  %v436_v2 = vsel (!%p278_p3), %vm434_vm0, %v1966_v1, 0  ;;  %v1969_v3 = vld [vmem:[%s2385_s3 + $0x20] sm:$0x3f] (!%p278_p3)  }
   0xb   : > { %1697 = vmatprep.mubr.msk.bf16.mxu1 (!%p278_p3), %vm2043_vm1, %v2042_v0  ;;  %1753 = vmatprep.mubr.msk.bf16.mxu0 (!%p278_p3), %vm2043_vm1, %v2042_v0  ;;  %p366_p7 = scmp.lt.s32.totalorder (!%p278_p3), %s363_s30, 7  ;;  %v2133_v4 = vsel (!%p278_p3), %vm434_vm0, %v1969_v3, 0  ;;  %v1968_v5 = vld [vmem:[%s2385_s3 + $0x8] sm:$0x3f] (!%p278_p3)   ;;  %p355_p8 = scmp.lt.s32.totalorder (!%p278_p3), %s352_s7, 7  ;;  %vm424_vm2 = vcmask (!%p278_p3), 97280  }
   0xc   : > { %1696 = vmatpush3.bf16.msra.mxu1 (!%p278_p3), %v436_v2  ;;  %1752 = vmatpush3.bf16.msra.mxu0 (!%p278_p3), %v2133_v4  ;;  %v544_v7 = vsel (!%p278_p3), %vm434_vm0, %v1968_v5, 0  ;;  %v1975_v9 = vld [vmem:[%s2385_s3 + $0x28] sm:$0x3f] (!%p278_p3)   ;;  %vm523_vm3 = vcmask (!%p278_p3), 1044480   ;;  %v1981_v31 = vld [vmem:[%s2385_s3 + $0x10] sm:$0x3f] (!%p278_p3)  }
   0xd   : > { %1709 = vmatprep.subr.bf16.mxu1 (!%p278_p3), %v2042_v0  ;;  %1765 = vmatprep.subr.bf16.mxu0 (!%p278_p3), %v2042_v0  ;;  %v941_v23 = vsel (!%p278_p3), %vm434_vm0, %v1975_v9, 0  ;;  %v1978_v37 = vld [vmem:[%s2385_s3 + $0x30] sm:$0x3f] (!%p278_p3)   ;;  %v640_v51 = vsel (!%p278_p3), %vm434_vm0, %v1981_v31, 0  ;;  %p376_p9 = scmp.lt.s32.totalorder (!%p278_p3), %s2024_s21, 5  ;;  %vm1334_vm4 = vcmask (!%p278_p3), 1043456  }
   0xe   : > { %v1040_v58 = vsel (!%p278_p3), %vm434_vm0, %v1978_v37, 0  ;;  %vm1359_vm5 = vcmask (!%p278_p3), 1040384  }
  0x10   : > { %s2400_s22 = smov (!%p343_p5, %s2028_s22), 1  ;;  %s2402_s30 = smov (!%p366_p7, %s363_s30), 7 }
  0x11   : > { %s346_s8 = scalar_select %p345_p6, %s2024_s21, 7 }
  0x12   : > { %s1918_s11 = smul.u32 48, %s2400_s22  ;;  %s2404_s7 = smov (!%p355_p8, %s352_s7), 7 }
  0x13   : > { %s1917_s12 = smul.u32 6, %s346_s8  ;;  %s2406_s21 = smov (!%p376_p9, %s2024_s21), 5 }
  0x14   : > { %s1920_s17 = smul.u32 6, %s2402_s30 }
  0x15   : > { %s349_s15 = sadd.s32 %s1918_s11, %s1917_s12  ;;  %s1919_s30 = smul.u32 6, %s2404_s7 }
  0x16   : > { %s1551_s16 = sshll.u32 %s349_s15, 2  ;;  %s370_s28 = sadd.s32 %s1920_s17, %s1918_s11 }
  0x17   : > { %s2143_s20 = scalar_lea.vmem %s2382_s0, %s1551_s16  ;;  %s1553_s29 = sshll.u32 %s370_s28, 2 }
  0x18   : > { %v1967_v6 = vld [vmem:[%s2143_s20] sm:$0xff]   ;;  %s2154_s10 = scalar_lea.vmem %s2384_s2, %s1553_s29  ;;  %s359_s12 = sadd.s32 %s1919_s30, %s1918_s11  ;;  %v1976_v8 = vld [vmem:[%s2143_s20 + $0x8] sm:$0xff]   ;;  %v1977_v17 = vld [vmem:[%s2143_s20 + $0x10] ss:$0 sps:$4 sm:$0x33]  }
  0x19   : > { %1698 = vmatmul.mubr.msk.bf16.vlgmr.msra.gmra.mrb[0].mxu1 %vm424_vm2, %v1967_v6  ;;  %s1552_s13 = sshll.u32 %s359_s12, 2  ;;  %v2175_v18 = vld [vmem:[%s2143_s20 + $0x8] sm:$0xf]  ;;  %v2178_v19 = vld [vmem:[%s2143_s20 + $0xc] sm:$0xf]  ;;  %s1923_s19 = smul.u32 6, %s2400_s22 }
  0x1a   : > { %1710 = vmatpush3.bf16.msra.mxu1 %v544_v7  ;;  %1701 = vmatprep.mubr.msk.bf16.mxu1 %vm2043_vm1, %v2042_v0  ;;  %s2160_s16 = scalar_lea.vmem %s2383_s1, %s1552_s13  ;;  %v1979_v25 = vld [vmem:[%s2143_s20] sm:$0xf8]   ;;  %v1567_v26 = vcombine.low %v2175_v18, %v2178_v19  ;;  %v1105_v29 = vld [vmem:[%s2154_s10 + $0x8] sm:$0xf]  ;;  %v503_v32 = vld [vmem:[%s2143_s20 + $0x10] sm:$0xf] }
  0x1b   : > { %1723 = vmatprep.subr.bf16.mxu1 %v2042_v0  ;;  %v804_v10 = vld [vmem:[%s2160_s16 + $0x8] sm:$0xf]  ;;  %v805_v11 = vld [vmem:[%s2160_s16 + $0xc] sm:$0xf]  ;;  %v806_v12 = vld [vmem:[%s2160_s16 + $0x10] sm:$0xf]  ;;  %v1576_v6 = vcombine.low %v2178_v19, %v503_v32  ;;  %s388_s28 = sadd.s32 %s1923_s19, %s2406_s21 }
  0x1c   : > { %v807_v13 = vld [vmem:[%s2160_s16 + $0x14] sm:$0x1]  ;;  %v1970_v14 = vld [vmem:[%s2160_s16] sm:$0xf8]   ;;  %v1594_v15 = vcombine.low %v804_v10, %v805_v11  ;;  %v1603_v28 = vcombine.low %v805_v11, %v806_v12  ;;  %v1106_v33 = vld [vmem:[%s2154_s10 + $0xc] sm:$0xf] }
  0x1d   : > { %v1595_v16 = vcombine.low %v806_v12, %v807_v13  ;;  %v826_v20 = vrot.slane %v1970_v14, 3  ;;  %v909_v22 = vld [vmem:[%s2160_s16 + $0x4] sm:$0xc]  ;;  %v524_v34 = vrot.slane %v1979_v25, 3  ;;  %v525_v35 = vrot.slane %v1567_v26, 3  ;;  %v1989_v19 = vld [vmem:[%s2154_s10 + $0x8] sm:$0xff]  }
  0x1e   : > { %v827_v21 = vrot.slane %v1594_v15, 3  ;;  %v1602_v27 = vcombine.low %v909_v22, %v804_v10  ;;  %v504_v38 = vld [vmem:[%s2143_s20 + $0x14] sm:$0x1]  ;;  %v1621_v39 = vcombine.low %v1105_v29, %v1106_v33  ;;  %v1107_v40 = vld [vmem:[%s2154_s10 + $0x10] sm:$0xf]  ;;  %v922_v42 = vrot.slane %v1603_v28, 2 }
  0x1f   : > { %v2190_v30 = vrot.slane %v1595_v16, 3  ;;  %v1108_v43 = vld [vmem:[%s2154_s10 + $0x14] sm:$0x1]  ;;  %v1630_v44 = vcombine.low %v1106_v33, %v1107_v40  ;;  %v1210_v46 = vld [vmem:[%s2154_s10 + $0x4] sm:$0xc]  ;;  %v526_v47 = vsel %vm523_vm3, %v524_v34, %v525_v35  ;;  %v1568_v48 = vcombine.low %v503_v32, %v504_v38  ;;  %s1922_s13 = smul.u32 30, %s2400_s22 }
  0x20   : > { %v828_v24 = vsel %vm523_vm3, %v826_v20, %v827_v21  ;;  %v921_v41 = vrot.slane %v1602_v27, 2  ;;  %v1622_v45 = vcombine.low %v1107_v40, %v1108_v43  ;;  %v1629_v50 = vcombine.low %v1210_v46, %v1105_v29  ;;  %v2219_v54 = vld [vmem:[%s2154_s10 + $0x14] ss:$0 sps:$4 sm:$0xff]   ;;  %v607_v5 = vld [vmem:[%s2143_s20 + $0x4] sm:$0xc]  ;;  %v1998_v27 = vld [vmem:[%s2160_s16 + $0x8] sm:$0xff]  }
  0x21   : > { %1702 = vmatmul.mubr.msk.bf16.gmra.mrb[4].mxu1 %vm424_vm2, %v1976_v8  ;;  %1754 = vmatmul.mubr.msk.bf16.vlgmr.msra.gmra.mrb[0].mxu0 %vm424_vm2, %v828_v24  ;;  %v2203_v36 = vsel %vm523_vm3, %v827_v21, %v2190_v30  ;;  %v1223_v49 = vrot.slane %v1630_v44, 2  ;;  %v2214_v52 = vrot.slane %v1621_v39, 3  ;;  %v1982_v56 = vld [vmem:[%s2160_s16 + $0x14] ss:$0 sps:$4 sm:$0xff]   ;;  %v1225_v60 = vrot.slane %v2219_v54, 2  ;;  %v1985_v14 = vld [vmem:[%s2154_s10] sm:$0xff]  }
  0x22   : > { %1705 = vmatprep.mubr.msk.bf16.mxu1 %vm2043_vm1, %v2042_v0  ;;  %1766 = vmatpush3.bf16.msra.mxu0 %v941_v23  ;;  %v2216_v53 = vrot.slane %v1622_v45, 3  ;;  %v923_v55 = vsel %vm434_vm0, %v921_v41, %v922_v42  ;;  %v1222_v57 = vrot.slane %v1629_v50, 2  ;;  %v527_v61 = vrot.slane %v1568_v48, 3  ;;  %v1988_v10 = vld [vmem:[%s2385_s3 + $0x18] sm:$0x3f]   ;;  %v1995_v24 = vld [vmem:[%s2160_s16] sm:$0xff]  }
  0x23   : > { %1767 = vmatprep.mubr.msk.bf16.mxu0 %vm2043_vm1, %v2042_v0  ;;  %1779 = vmatprep.subr.bf16.mxu0 %v2042_v0  ;;  %v2241_v63 = vsel %vm434_vm0, %v1223_v49, %v1225_v60  ;;  %v924_v1 = vrot.slane %v1982_v56, 2  ;;  %v1575_v7 = vcombine.low %v607_v5, %v2175_v18  ;;  %v621_v8 = vrot.slane %v1576_v6, 2  ;;  %v1986_v11 = vld [vmem:[%s2385_s3 + $0x38] sm:$0x3f]   ;;  %v1990_v13 = vld [vmem:[%s2143_s20 + $0x14] ss:$0 sps:$4 sm:$0xff]  }
  0x24   : > { %v2228_v59 = vsel %vm523_vm3, %v2214_v52, %v2216_v53  ;;  %v2234_v62 = vsel %vm434_vm0, %v1222_v57, %v1223_v49  ;;  %v528_v2 = vsel %vm523_vm3, %v525_v35, %v527_v61  ;;  %v739_v15 = vsel %vm434_vm0, %v1988_v10, 0  ;;  %v1991_v20 = vld [vmem:[%s2154_s10 + $0x10] ss:$0 sps:$4 sm:$0x33]   ;;  %v1992_v21 = vld [vmem:[%s2154_s10] sm:$0xf8]  }
  0x25   : > { %v925_v3 = vsel %vm434_vm0, %v922_v42, %v924_v1  ;;  %v620_v9 = vrot.slane %v1575_v7, 2  ;;  %v1147_v16 = vsel %vm434_vm0, %v1986_v11, 0  ;;  %v1127_v22 = vrot.slane %v1992_v21, 3  ;;  %v1994_v23 = vld [vmem:[%s2385_s3 + $0x40] sm:$0x3f]   ;;  %s1921_s10 = smul.u32 5, %s2406_s21 }
  0x26   : > { %v1242_v26 = vsel %vm434_vm0, %v1994_v23, 0  ;;  %s1555_s29 = sshll.u32 %s388_s28, 1 }
  0x27   : > { %v622_v12 = vsel %vm434_vm0, %v620_v9, %v621_v8  ;;  %v1129_v25 = vsel %vm523_vm3, %v1127_v22, %v2214_v52  ;;  %s390_s9 = scalar_lea.vmem %s2388_s6, %s1555_s29 }
  0x29   : > { %1706 = vmatmul.mubr.msk.bf16.gmra.mrb[8].mxu1 %vm424_vm2, %v1977_v17  ;;  %v623_v17 = vrot.slane %v1990_v13, 2 }
  0x2a   : > { %1711 = vmatprep.mubr.msk.bf16.mxu1 %vm2043_vm1, %v2042_v0 }
  0x2b   : > { %v624_v18 = vsel %vm434_vm0, %v621_v8, %v623_v17 }
  0x2d   : > { %1768 = vmatmul.mubr.msk.bf16.vlgmr.msra.gmra.mrb[0].mxu0 %vm424_vm2, %v923_v55 }
  0x2e   : > { %1780 = vmatpush3.bf16.msra.mxu0 %v1040_v58  ;;  %1771 = vmatprep.mubr.msk.bf16.mxu0 %vm2043_vm1, %v2042_v0 }
  0x2f   : > { %1793 = vmatprep.subr.bf16.mxu0 %v2042_v0 }
  0x31   : > { %1712 = vmatmul.mubr.msk.bf16.vlgmr.msra.gmra.mrb[0].mxu1 %vm424_vm2, %v526_v47 }
  0x32   : > { %1724 = vmatpush3.bf16.msra.mxu1 %v640_v51  ;;  %1715 = vmatprep.mubr.msk.bf16.mxu1 %vm2043_vm1, %v2042_v0 }
  0x33   : > { %1737 = vmatprep.subr.bf16.mxu1 %v2042_v0 }
  0x35   : > { %1772 = vmatmul.mubr.msk.bf16.gmra.mrb[4].mxu0 %vm424_vm2, %v925_v3 }
  0x36   : > { %1775 = vmatprep.mubr.msk.bf16.mxu0 %vm2043_vm1, %v2042_v0 }
  0x39   : > { %1716 = vmatmul.mubr.msk.bf16.gmra.mrb[4].mxu1 %vm424_vm2, %v528_v2 }
  0x3a   : > { %1719 = vmatprep.mubr.msk.bf16.mxu1 %vm2043_vm1, %v2042_v0 }
  0x3d   : > { %1776 = vmatmul.mubr.msk.bf16.gmra.mrb[8].mxu0 %vm424_vm2, %v924_v1 }
  0x3e   : > { %1781 = vmatprep.mubr.msk.bf16.mxu0 %vm2043_vm1, %v2042_v0 }
  0x41   : > { %1720 = vmatmul.mubr.msk.bf16.gmra.mrb[8].mxu1 %vm424_vm2, %v527_v61 }
  0x42   : > { %1725 = vmatprep.mubr.msk.bf16.mxu1 %vm2043_vm1, %v2042_v0 }
  0x45   : > { %1782 = vmatmul.mubr.msk.bf16.vlgmr.msra.gmra.mrb[0].mxu0 %vm424_vm2, %v1985_v14 }
  0x46   : > { %1794 = vmatpush3.bf16.msra.mxu0 %v1147_v16  ;;  %1785 = vmatprep.mubr.msk.bf16.mxu0 %vm2043_vm1, %v2042_v0 }
  0x47   : > { %1807 = vmatprep.subr.bf16.mxu0 %v2042_v0 }
  0x49   : > { %1726 = vmatmul.mubr.msk.bf16.vlgmr.msra.gmra.mrb[0].mxu1 %vm424_vm2, %v622_v12 }
  0x4a   : > { %1738 = vmatpush3.bf16.msra.mxu1 %v739_v15  ;;  %1729 = vmatprep.mubr.msk.bf16.mxu1 %vm2043_vm1, %v2042_v0 }
  0x4b   : > { %1821 = vmatprep.subr.bf16.mxu1 %v2042_v0 }
  0x4d   : > { %1786 = vmatmul.mubr.msk.bf16.gmra.mrb[4].mxu0 %vm424_vm2, %v1989_v19 }
  0x4e   : > { %1789 = vmatprep.mubr.msk.bf16.mxu0 %vm2043_vm1, %v2042_v0 }
  0x51   : > { %1730 = vmatmul.mubr.msk.bf16.gmra.mrb[4].mxu1 %vm424_vm2, %v624_v18 }
  0x52   : > { %1733 = vmatprep.mubr.msk.bf16.mxu1 %vm2043_vm1, %v2042_v0 }
  0x55   : > { %1790 = vmatmul.mubr.msk.bf16.gmra.mrb[8].mxu0 %vm424_vm2, %v1991_v20 }
  0x56   : > { %1795 = vmatprep.mubr.msk.bf16.mxu0 %vm2043_vm1, %v2042_v0 }
  0x59   : > { %1734 = vmatmul.mubr.msk.bf16.gmra.mrb[8].mxu1 %vm424_vm2, %v623_v17 }
  0x5a   : > { %1739 = vmatprep.mubr.msk.bf16.mxu1 %vm2043_vm1, %v2042_v0 }
  0x5d   : > { %1796 = vmatmul.mubr.msk.bf16.vlgmr.msra.gmra.mrb[0].mxu0 %vm424_vm2, %v1129_v25 }
  0x5e   : > { %1808 = vmatpush3.bf16.msra.mxu0 %v1242_v26  ;;  %1799 = vmatprep.mubr.msk.bf16.mxu0 %vm2043_vm1, %v2042_v0 }
  0x61   : > { %1740 = vmatmul.mubr.msk.bf16.vlgmr.msra.gmra.mrb[0].mxu1 %vm424_vm2, %v1995_v24 }
  0x62   : > { %1822 = vmatpush3.bf16.msra.mxu1 %v2133_v4  ;;  %1743 = vmatprep.mubr.msk.bf16.mxu1 %vm2043_vm1, %v2042_v0  ;;  %v1999_v4 = vld [vmem:[%s2160_s16 + $0x10] ss:$0 sps:$4 sm:$0x33]   ;;  %s380_s16 = sadd.s32 %s1922_s13, %s1921_s10 }
  0x63   : > { %s1554_s17 = sshll.u32 %s380_s16, 2 }
  0x64   : > { %s2357_s18 = scalar_lea.vmem %s2387_s5, %s1554_s17 }
  0x65   : > { %1800 = vmatmul.mubr.msk.bf16.gmra.mrb[4].mxu0 %vm424_vm2, %v2228_v59 }
  0x66   : > { %1803 = vmatprep.mubr.msk.bf16.mxu0 %vm2043_vm1, %v2042_v0 }
  0x69   : > { %1744 = vmatmul.mubr.msk.bf16.gmra.mrb[4].mxu1 %vm424_vm2, %v1998_v27 }
  0x6a   : > { %1747 = vmatprep.mubr.msk.bf16.mxu1 %vm2043_vm1, %v2042_v0 }
  0x6d   : > { %1804 = vmatmul.mubr.msk.bf16.gmra.mrb[8].mxu0 %vm424_vm2, %v2216_v53 }
  0x6e   : > { %1809 = vmatprep.mubr.msk.bf16.mxu0 %vm2043_vm1, %v2042_v0 }
  0x71   : > { %1748 = vmatmul.mubr.msk.bf16.gmra.mrb[8].mxu1 %vm424_vm2, %v1999_v4 }
  0x72   : > { %1757 = vmatprep.mubr.msk.bf16.mxu1 %vm2043_vm1, %v2042_v0 }
  0x75   : > { %1810 = vmatmul.mubr.msk.bf16.vlgmr.msra.gmra.mrb[0].mxu0 %vm424_vm2, %v2234_v62 }
  0x76   : > { %1813 = vmatprep.mubr.msk.bf16.mxu0 %vm2043_vm1, %v2042_v0 }
  0x79   : > { %1758 = vmatmul.mubr.msk.bf16.vlgmr.msra.gmra.mrb[4].mxu1 %vm424_vm2, %v2203_v36 }
  0x7a   : > { %1761 = vmatprep.mubr.msk.bf16.mxu1 %vm2043_vm1, %v2042_v0 }
  0x7d   : > { %1814 = vmatmul.mubr.msk.bf16.gmra.mrb[4].mxu0 %vm424_vm2, %v2241_v63 }
  0x7e   : > { %1817 = vmatprep.mubr.msk.bf16.mxu0 %vm2043_vm1, %v2042_v0 }
  0x81   : > { %1762 = vmatmul.mubr.msk.bf16.gmra.mrb[8].mxu1 %vm424_vm2, %v2190_v30  ;;  %v1556_v30 = vld [vmem:[%s2386_s4] ss:$0 sm:$0xff] }
  0x85   : > { %1818 = vmatmul.mubr.msk.bf16.gmra.mrb[8].mxu0 %vm424_vm2, %v1225_v60 }
 0x134   : > { %v775_v28 = vpop.f32.mrb[0].mxu1 }
 0x135   : > { %v1741_v29 = vpop.f32.mrb[1].mxu1  ;;  %v1823_v33 = vadd.f32 %v1556_v30, %v775_v28 }
 0x136   : > { %v778_v31 = vpop.f32.mrb[2].mxu1 }
 0x137   : > { %v1742_v32 = vpop.f32.mrb[3].mxu1  ;;  %v1825_v37 = vadd.f32 %v1556_v30, %v778_v31 }
 0x148   : > { %v1278_v35 = vpop.f32.mrb[0].mxu0 }
 0x149   : > { %v1824_v38 = vadd.f32 %v1823_v33, %v1278_v35  ;;  %v1811_v39 = vpop.f32.mrb[1].mxu0 }
 0x14a   : > { %v1281_v41 = vpop.f32.mrb[2].mxu0 }
 0x14b   : > { %v1826_v42 = vadd.f32 %v1825_v37, %v1281_v41  ;;  %v1812_v43 = vpop.f32.mrb[3].mxu0  ;;  %v1343_v45 = vmul.f32 %v1824_v38, %v1824_v38 }
 0x14c   : > { %v890_v0 = vpop.f32.mrb[4].mxu1 }
 0x14d   : > { %v1759_v34 = vpop.f32.mrb[5].mxu1  ;;  %v1827_v44 = vadd.f32 %v1556_v30, %v890_v0  ;;  %v1651_v46 = vpack.c.bf16 %v1826_v42, %v1824_v38  ;;  %v1331_v47 = vadd.f32 %v1826_v42, %v1824_v38  ;;  %v1344_v48 = vmul.f32 %v1826_v42, %v1826_v42 }
 0x14e   : > { %v893_v36 = vpop.f32.mrb[6].mxu1 }
 0x14f   : > { %v1760_v40 = vpop.f32.mrb[7].mxu1  ;;  %1652 = vst [vmem:[%s2357_s18] sm:$0xff] %v1651_v46   ;;  %v1348_v50 = vadd.f32 %v1344_v48, %v1343_v45  ;;  %v1829_v51 = vadd.f32 %v1556_v30, %v893_v36 }
 0x150   : > { %v1286_v53 = vpop.f32.mrb[4].mxu0 }
 0x151   : > { %v1828_v55 = vadd.f32 %v1827_v44, %v1286_v53  ;;  %v1815_v56 = vpop.f32.mrb[5].mxu0 }
 0x152   : > { %v1289_v58 = vpop.f32.mrb[6].mxu0 }
 0x153   : > { %v1332_v59 = vadd.f32 %v1828_v55, %v1331_v47  ;;  %v1345_v60 = vmul.f32 %v1828_v55, %v1828_v55  ;;  %v1830_v61 = vadd.f32 %v1829_v51, %v1289_v58  ;;  %v1816_v62 = vpop.f32.mrb[7].mxu0 }
 0x154   : > { %v898_v49 = vpop.f32.mrb[8].mxu1 }
 0x155   : > { %v1763_v52 = vpop.f32.mrb[9].mxu1  ;;  %v1831_v63 = vadd.f32 %v1556_v30, %v898_v49  ;;  %v1349_v1 = vadd.f32 %v1348_v50, %v1345_v60  ;;  %v1656_v2 = vpack.c.bf16 %v1830_v61, %v1828_v55  ;;  %v1333_v3 = vadd.f32 %v1830_v61, %v1332_v59 }
 0x156   : > { %v901_v54 = vpop.f32.mrb[10].mxu1  ;;  %v1346_v5 = vmul.f32 %v1830_v61, %v1830_v61 }
 0x157   : > { %v1764_v57 = vpop.f32.mrb[11].mxu1  ;;  %1658 = vst [vmem:[%s2357_s18 + $0x8] sm:$0xff] %v1656_v2  }
 0x158   : > { %v1350_v6 = vadd.f32 %v1349_v1, %v1346_v5  ;;  %v1294_v7 = vpop.f32.mrb[8].mxu0 }
 0x159   : > { %v1832_v8 = vadd.f32 %v1831_v63, %v1294_v7  ;;  %v1819_v9 = vpop.f32.mrb[9].mxu0 }
 0x15a   : > { %v1297_v10 = vpop.f32.mrb[10].mxu0 }
 0x15b   : > { %v1647_v11 = vpack.c.bf16 %v1832_v8, %v1832_v8  ;;  %v1335_v12 = vsel %vm1334_vm4, %v1832_v8, 0.0  ;;  %v1347_v13 = vmul.f32 %v1832_v8, %v1832_v8  ;;  %v1820_v14 = vpop.f32.mrb[11].mxu0 }
 0x15c   : > { %v1336_v15 = vadd.f32 %v1335_v12, %v1333_v3 }
 0x15d   : > { %1330 = vst [vmem:[%s2357_s18 + $0x10] sm:$0x3] %v1647_v11  ;;  %v1351_v16 = vsel %vm1334_vm4, %v1347_v13, 0.0 }
 0x15e   : > { %v1337_v17 = vrot.slane %v1336_v15, 4  ;;  %v1352_v18 = vadd.f32 %v1351_v16, %v1350_v6 }
 0x160   : > { %v1338_v19 = vadd.f32 %v1337_v17, %v1336_v15  ;;  %v1353_v20 = vrot.slane %v1352_v18, 4 }
 0x162   : > { %v1339_v21 = vrot.slane %v1338_v19, 2  ;;  %v1354_v22 = vadd.f32 %v1353_v20, %v1352_v18 }
 0x164   : > { %v1340_v23 = vadd.f32 %v1339_v21, %v1338_v19  ;;  %v1355_v24 = vrot.slane %v1354_v22, 2 }
 0x166   : > { %v1341_v25 = vrot.slane %v1340_v23, 1  ;;  %v1356_v26 = vadd.f32 %v1355_v24, %v1354_v22 }
 0x168   : > { %v1357_v27 = vrot.slane %v1356_v26, 1  ;;  %v1342_v4 = vadd.f32 %v1341_v25, %v1340_v23 }
 0x16a   : > { %v1358_v28 = vadd.f32 %v1357_v27, %v1356_v26 }
 0x16c   : > { %v1360_v29 = vsel %vm1359_vm5, %v1342_v4, %v1358_v28 }
 0x16d   : > { %1361 = vst [vmem:[%s390_s9] sm:$0x3] %v1360_v29 }
 0x16e PF: > { %s17_s25 = sadd.s32 1, %s2040_s25   ;;  %s2389_s21 = smov %s2032_s23 }
 0x16f   : > { %p14_p10 = scmp.ge.s32.totalorder %s17_s25, 14   ;;  %s2390_s22 = smov %s2036_s24 }
 0x170   : > { %s2391_s23 = smov %s2394_s26  ;;  %s2392_s24 = smov %s2398_s27 }
 0x171   :  { %16 = sbr.rel (!%p14_p10) target bundleno = 3 (0x3), region = 96 }

</bundles_post_ra>
